<compile_context>
chip_gen: v7x
topology: tpu7x:2x2x1
jax: 0.10.0
libtpu: 0.0.40
codegen_flags: <defaults>
</compile_context>

<pallas_src>
import functools

import jax
import jax.numpy as jnp
from jax.experimental import pallas as pl
from jax.experimental.pallas import tpu as pltpu

LANES = 128


def _round_up(n, m):
    return ((n + m - 1) // m) * m


def _hnn_cubic_kernel(x_ref, shift_ref, w_ref, b_ref, o_ref):
    x = x_ref[...]                                     # (TB, D)
    xs = x - shift_ref[...]                            # broadcast (1, D)
    x2 = xs * xs                                       # (TB, D)
    x_aug = jnp.concatenate([x, x2], axis=-1)          # (TB, 2D)

    # Single fused MXU matmul: columns [0:D) = linear head, [D:3D) = quad head,
    # [3D:N_pad) = zero padding (contributes 0 after square+sum).
    y = (jnp.dot(x_aug, w_ref[...], preferred_element_type=jnp.float32)
         + b_ref[...])                                 # (TB, N_pad)

    # One dense square + one lane reduction for both heads at once.
    o_ref[...] = jnp.sum(y * y, axis=-1, keepdims=True)  # (TB, 1)


def pack_hnn_cubic_params(w_lin, b_lin, w_quad, b_quad, shift):
    """One-time parameter prep (call once, outside the hot path).

    w_lin:  (D, D)   PyTorch layout (out, in)
    w_quad: (2D, 2D) PyTorch layout (out, in)
    b_lin:  (D,), b_quad: (2D,), shift: (1, D)
    Returns (w_aug, b_aug, shift) with output width padded to 128 lanes.
    """
    D = w_lin.shape[0]
    wl_t = w_lin.astype(jnp.float32).T                 # (D, D)   acts on x
    wq_t = w_quad.astype(jnp.float32).T                # (2D, 2D) rows = inputs
    wq1 = wq_t[:D, :]                                  # acts on x   -> (D, 2D)
    wq2 = wq_t[D:, :]                                  # acts on x2  -> (D, 2D)

    top = jnp.concatenate([wl_t, wq1], axis=1)                      # (D, 3D)
    bot = jnp.concatenate([jnp.zeros((D, D), jnp.float32), wq2], 1)  # (D, 3D)
    w_aug = jnp.concatenate([top, bot], axis=0)                     # (2D, 3D)
    b_aug = jnp.concatenate([b_lin, b_quad]).astype(jnp.float32)
    b_aug = b_aug.reshape(1, 3 * D)                                 # (1, 3D)

    n = 3 * D
    n_pad = max(LANES, _round_up(n, LANES))
    if n_pad != n:
        w_aug = jnp.pad(w_aug, ((0, 0), (0, n_pad - n)))
        b_aug = jnp.pad(b_aug, ((0, 0), (0, n_pad - n)))
    return w_aug, b_aug, shift.astype(jnp.float32).reshape(1, D)


@functools.partial(jax.jit, static_argnames=("block_b",))
def hnn_cubic_forward(x, w_aug, b_aug, shift, *, block_b=1024):
    """x: (B, D) float32; packed params from pack_hnn_cubic_params."""
    x = x.astype(jnp.float32)
    B, D = x.shape
    n_pad = w_aug.shape[1]

    # Batch tile: multiple of 8 sublanes, capped so VMEM stays tiny even on
    # v7x (x tile double-buffered + (TB, 128) intermediate << scoped VMEM).
    tb = min(block_b, _round_up(B, 8))
    b_pad = _round_up(B, tb)
    if b_pad != B:
        x = jnp.pad(x, ((0, b_pad - B), (0, 0)))
    grid = (b_pad // tb,)

    out = pl.pallas_call(
        _hnn_cubic_kernel,
        out_shape=jax.ShapeDtypeStruct((b_pad, 1), jnp.float32),
        grid=grid,
        in_specs=[
            pl.BlockSpec((tb, D), lambda i: (i, 0)),        # x: tiled over batch
            pl.BlockSpec((1, D), lambda i: (0, 0)),         # shift: resident
            pl.BlockSpec((2 * D, n_pad), lambda i: (0, 0)),  # W_aug: resident
            pl.BlockSpec((1, n_pad), lambda i: (0, 0)),     # b_aug: resident
        ],
        out_specs=pl.BlockSpec((tb, 1), lambda i: (i, 0)),
        compiler_params=pltpu.CompilerParams(
            dimension_semantics=("parallel",)),             # v7x: 2 TCs
    )(x, shift, w_aug, b_aug)
    return out[:B]


def reference_forward(x, w_lin, b_lin, w_quad, b_quad, shift):
    rl = x @ w_lin.T + b_lin
    rl = jnp.sum(rl ** 2, axis=-1, keepdims=True)
    x2 = (x - shift) ** 2
    x_all = jnp.concatenate([x, x2], axis=-1)
    rq = x_all @ w_quad.T + b_quad
    rq = jnp.sum(rq ** 2, axis=-1, keepdims=True)
    return rq + rl


if __name__ == "__main__":
    dim = 32
    batch = 8

    key = jax.random.PRNGKey(0)
    kx, kwl, kbl, kwq, kbq, kx2 = jax.random.split(key, 6)

    x = jax.random.normal(kx, (batch, dim), dtype=jnp.float32)

    # Deterministic parameter init (nn.Linear-style uniform bounds).
    bound_l = 1.0 / (dim ** 0.5)
    w_lin = jax.random.uniform(kwl, (dim, dim), jnp.float32, -bound_l, bound_l)
    b_lin = jax.random.uniform(kbl, (dim,), jnp.float32, -bound_l, bound_l)
    bound_q = 1.0 / ((2 * dim) ** 0.5)
    w_quad = jax.random.uniform(kwq, (2 * dim, 2 * dim), jnp.float32,
                                -bound_q, bound_q)
    b_quad = jax.random.uniform(kbq, (2 * dim,), jnp.float32,
                                -bound_q, bound_q)
    shift = jnp.zeros((1, dim), jnp.float32)       # nn.Parameter(zeros(1, dim))

    # One-time parameter packing (hoisted out of the per-call hot path).
    w_aug, b_aug, shift_p = pack_hnn_cubic_params(w_lin, b_lin, w_quad,
                                                  b_quad, shift)

    # Small-batch check (single grid step).
    out = hnn_cubic_forward(x, w_aug, b_aug, shift_p)
    out = jax.block_until_ready(out)
    ref = reference_forward(x, w_lin, b_lin, w_quad, b_quad, shift)
    assert out.shape == (batch, 1)
    assert jnp.allclose(out, ref, rtol=1e-5, atol=1e-5)

    # Larger, non-multiple batch check (exercises grid + batch padding path).
    batch2 = 200
    x_big = jax.random.normal(kx2, (batch2, dim), dtype=jnp.float32)
    out_big = hnn_cubic_forward(x_big, w_aug, b_aug, shift_p, block_b=64)
    out_big = jax.block_until_ready(out_big)
    ref_big = reference_forward(x_big, w_lin, b_lin, w_quad, b_quad, shift)
    assert out_big.shape == (batch2, 1)
    assert jnp.allclose(out_big, ref_big, rtol=1e-5, atol=1e-5)

    print("KERNEL_OK")
</pallas_src>

<mosaic_0001>
module attributes {stable_mosaic.version = 11 : i64} {
  func.func @_hnn_cubic_kernel(%arg0: i32, %arg1: memref<8x32xf32, #tpu.memory_space<vmem>>, %arg2: memref<1x32xf32, #tpu.memory_space<vmem>>, %arg3: memref<64x128xf32, #tpu.memory_space<vmem>>, %arg4: memref<1x128xf32, #tpu.memory_space<vmem>>, %arg5: memref<8x1xf32, #tpu.memory_space<vmem>>) attributes {dimension_semantics = [#tpu.dimension_semantics<parallel>], iteration_bounds = array<i64: 1>, scalar_prefetch = 0 : i64, scratch_operands = 0 : i64, tpu.core_type = #tpu.core_type<tc>, window_params = [{transform_indices = @transform_0, window_bounds = array<i64: 8, 32>}, {pipeline_mode = #tpu.pipeline_mode<synchronous>, transform_indices = @transform_1, window_bounds = array<i64: 1, 32>}, {pipeline_mode = #tpu.pipeline_mode<synchronous>, transform_indices = @transform_2, window_bounds = array<i64: 64, 128>}, {pipeline_mode = #tpu.pipeline_mode<synchronous>, transform_indices = @transform_3, window_bounds = array<i64: 1, 128>}, {transform_indices = @transform_4, window_bounds = array<i64: 8, 1>}]} {
    %c0 = arith.constant 0 : index
    %c0_0 = arith.constant 0 : index
    %0 = vector.load %arg1[%c0, %c0_0] : memref<8x32xf32, #tpu.memory_space<vmem>>, vector<8x32xf32>
    %c0_1 = arith.constant 0 : index
    %c0_2 = arith.constant 0 : index
    %1 = vector.load %arg2[%c0_1, %c0_2] : memref<1x32xf32, #tpu.memory_space<vmem>>, vector<1x32xf32>
    %2 = vector.broadcast %1 : vector<1x32xf32> to vector<8x32xf32>
    %3 = arith.subf %0, %2 : vector<8x32xf32>
    %4 = arith.mulf %3, %3 : vector<8x32xf32>
    %5 = tpu.concatenate %0, %4 in 1 : vector<8x32xf32>, vector<8x32xf32> -> vector<8x64xf32>
    %c0_3 = arith.constant 0 : index
    %c0_4 = arith.constant 0 : index
    %6 = vector.load %arg3[%c0_3, %c0_4] : memref<64x128xf32, #tpu.memory_space<vmem>>, vector<64x128xf32>
    %cst = arith.constant dense<0.000000e+00> : vector<8x128xf32>
    %7 = tpu.matmul %5, %6, %cst {dimension_numbers = #tpu.dot_dimension_numbers<[1], [0], [0], [1], [0, 0, 1, 1], [], []>} : vector<8x64xf32>, vector<64x128xf32>, vector<8x128xf32> -> vector<8x128xf32>
    %c0_5 = arith.constant 0 : index
    %c0_6 = arith.constant 0 : index
    %8 = vector.load %arg4[%c0_5, %c0_6] : memref<1x128xf32, #tpu.memory_space<vmem>>, vector<1x128xf32>
    %9 = vector.broadcast %8 : vector<1x128xf32> to vector<8x128xf32>
    %10 = arith.addf %7, %9 : vector<8x128xf32>
    %11 = arith.mulf %10, %10 : vector<8x128xf32>
    %cst_7 = arith.constant dense<0.000000e+00> : vector<8xf32>
    %12 = vector.multi_reduction <add>, %11, %cst_7 [1] : vector<8x128xf32> to vector<8xf32>
    %13 = vector.shape_cast %12 : vector<8xf32> to vector<8x1xf32>
    %c0_8 = arith.constant 0 : index
    %c0_9 = arith.constant 0 : index
    %14 = vector.load %arg5[%c0_8, %c0_9] : memref<8x1xf32, #tpu.memory_space<vmem>>, vector<8x1xf32>
    tpu.vector_store %arg5[%c0_8, %c0_9], %13 {strides = array<i32>} : memref<8x1xf32, #tpu.memory_space<vmem>>, vector<8x1xf32>,
    return
  }
  func.func @transform_0(%arg0: i32) -> (i32, i32) {
    %c0_i32 = arith.constant 0 : i32
    %c0_i32_0 = arith.constant 0 : i32
    return %arg0, %c0_i32 : i32, i32
  }
  func.func @transform_1(%arg0: i32) -> (i32, i32) {
    %c0_i32 = arith.constant 0 : i32
    %c0_i32_0 = arith.constant 0 : i32
    %c0_i32_1 = arith.constant 0 : i32
    return %c0_i32, %c0_i32_0 : i32, i32
  }
  func.func @transform_2(%arg0: i32) -> (i32, i32) {
    %c0_i32 = arith.constant 0 : i32
    %c0_i32_0 = arith.constant 0 : i32
    %c0_i32_1 = arith.constant 0 : i32
    return %c0_i32, %c0_i32_0 : i32, i32
  }
  func.func @transform_3(%arg0: i32) -> (i32, i32) {
    %c0_i32 = arith.constant 0 : i32
    %c0_i32_0 = arith.constant 0 : i32
    %c0_i32_1 = arith.constant 0 : i32
    return %c0_i32, %c0_i32_0 : i32, i32
  }
  func.func @transform_4(%arg0: i32) -> (i32, i32) {
    %c0_i32 = arith.constant 0 : i32
    %c0_i32_0 = arith.constant 0 : i32
    return %arg0, %c0_i32 : i32, i32
  }
}

</mosaic_0001>

<bundles_post_ra>
// kernel: hnn_cubic_forward.1
= control target key start
LH: loop header
LB: loop body
LE: loop exit
PB: predicated region body
PF: predicated region fallthrough
CT: control target
= control target key end

     0   :  { %9 = vsyncpa [#allocation3], 0  ;;  %s331_s0 = inlined_call_operand.hbm [shape: f32[8,32], index: 0, kind: input, shape index: {}]   ;;  %s332_s1 = inlined_call_operand.vmem [shape: f32[1,32], index: 1, kind: input, shape index: {}]   ;;  %s333_s2 = inlined_call_operand.hbm [shape: f32[64,128], index: 2, kind: input, shape index: {}]   ;;  %s334_s3 = inlined_call_operand.vmem [shape: f32[1,128], index: 3, kind: input, shape index: {}]   ;;  %s335_s4 = inlined_call_operand.vmem [shape: f32[8,1], index: 4, kind: output, shape index: {}]  }
   0x1   :  { %10 = vsyncpa [#allocation5], 0  ;;  %s258_s15 = smov [#allocation2]   ;;  %s259_s17 = smov [#allocation4]  }
   0x2   :  { %s17_s16 = sshll.u32 %s258_s15, 4  ;;  %s28_s18 = sshll.u32 %s259_s17, 4  ;;  %s18_s16 = int_to_ptr.vmem [resolvable:$true] %s17_s16  ;;  %s291_s18 = int_to_ptr.vmem [resolvable:$true] %s28_s18 }
   0x3   :  { %s210_s21 = scalar_lea.hbm %s331_s0, 128 }
   0x4   :  { %p211_p0 = scmp.ne.s32.totalorder %s331_s0, %s210_s21  ;;  %p214_p1 = scmp.lt.u32.totalorder %s210_s21, %s331_s0 }
   0x6   :  { %p216_p2 = pnand %p214_p1, %p211_p0 }
   0x8   :  { %219 = shalt.err (!%p216_p2)
}
   0x9   :  { %s220_s26 = scalar_lea.vmem %s18_s16, 128  ;;  %p225_p4 = scmp.lt.s32.totalorder %s18_s16, %s18_s16 }
   0xa   :  { %p221_p3 = scmp.ne.s32.totalorder %s18_s16, %s220_s26  ;;  %p226_p5 = scmp.lt.s32.totalorder %s220_s26, %s220_s26 }
   0xc   :  { %p227_p6 = por %p226_p5, %p225_p4 }
   0xe   :  { %p228_p7 = pnand %p227_p6, %p221_p3 }
  0x10   :  { %231 = shalt.err (!%p228_p7)
}
  0x11   :  { %20 = dma.hbm_to_vmem [thread:$0]  %s331_s0, 128, %s18_s16, [#allocation3]  }
  0x12   :  { %s232_s5 = scalar_lea.hbm %s333_s2, 1024 }
  0x13   :  { %p233_p8 = scmp.ne.s32.totalorder %s333_s2, %s232_s5  ;;  %p236_p9 = scmp.lt.u32.totalorder %s232_s5, %s333_s2 }
  0x15   :  { %p238_p10 = pnand %p236_p9, %p233_p8 }
  0x17   :  { %241 = shalt.err (!%p238_p10)
}
  0x18   :  { %s242_s10 = scalar_lea.vmem %s291_s18, 1024  ;;  %p247_p12 = scmp.lt.s32.totalorder %s291_s18, %s291_s18 }
  0x19   :  { %p243_p11 = scmp.ne.s32.totalorder %s291_s18, %s242_s10  ;;  %p248_p13 = scmp.lt.s32.totalorder %s242_s10, %s242_s10 }
  0x1b   :  { %p249_p0 = por %p248_p13, %p247_p12 }
  0x1d   :  { %p250_p1 = pnand %p249_p0, %p243_p11 }
  0x1f   :  { %253 = shalt.err (!%p250_p1)
}
  0x20   :  { %s260_s0 = smov 128   ;;  %s261_s11 = smov 8  }
  0x21   :  { %34 = dma.hbm_to_vmem [thread:$0]  %s333_s2, 1024, %s291_s18, [#allocation5], %s260_s0, %s260_s0, %s261_s11  }
  0x22   :  { %254 = dma.done.wait [#allocation3], 128  }
  0x23   :  { %255 = vsyncadd [#allocation3], 4294967168 }
  0x24   :  { %256 = dma.done.wait [#allocation5], 1024  }
  0x25   :  { %257 = vsyncadd [#allocation5], 4294966272  ;;  %v262_v0 = vmov 0.0|0.0   ;;  %vm263_vm0 = vmmov 0   ;;  %v264_v1 = vmov 0.0   ;;  %v43_v2 = vld [vmem:[#allocation2] sm:$0xff] }
  0x26   :  { %190 = vmatprep.subr.bf16.mxu0 %v262_v0  ;;  %187 = vmatprep.mubr.msk.f32.mxu0 %vm263_vm0, %v264_v1  ;;  %v159_v3 = vld [vmem:[%s332_s1] ss:$0 sm:$0xff]  ;;  %v59_v4 = vld [vmem:[#allocation4] sm:$0xff]  ;;  %v60_v6 = vld [vmem:[#allocation4 + $0x8] sm:$0xff]  ;;  %s265_s2 = smov 32   ;;  %vm57_vm1 = vcmask 261120  }
  0x27   :  { %v51_v5 = vsub.f32 %v43_v2, %v159_v3  ;;  %v61_v7 = vld [vmem:[#allocation4 + $0x10] sm:$0xff]  ;;  %v62_v8 = vld [vmem:[#allocation4 + $0x18] sm:$0xff]  ;;  %v191_v9 = vpack.c.bf16 %v60_v6, %v59_v4  ;;  %v63_v12 = vld [vmem:[#allocation4 + $0x20] sm:$0xff]  ;;  %vm74_vm2 = vcmask 523264   ;;  %vm151_vm3 = vcmask 7168  }
  0x28   :  { %v194_v11 = vpack.c.bf16 %v62_v8, %v61_v7  ;;  %v64_v13 = vld [vmem:[#allocation4 + $0x28] sm:$0xff]  ;;  %v65_v15 = vld [vmem:[#allocation4 + $0x30] sm:$0xff]  ;;  %v66_v16 = vld [vmem:[#allocation4 + $0x38] sm:$0xff] }
  0x29   :  { %v52_v10 = vmul.f32 %v51_v5, %v51_v5  ;;  %192 = vmatpush3.bf16.msra.mxu0 %v191_v9  ;;  %v197_v14 = vpack.c.bf16 %v64_v13, %v63_v12  ;;  %v200_v17 = vpack.c.bf16 %v66_v16, %v65_v15  ;;  %v160_v20 = vld [vmem:[%s334_s3] ss:$0 sm:$0xff] }
  0x2a   :  { %193 = vmatprep.subr.bf16.mxu0 %v262_v0 }
  0x2b   :  { %54 = vrot.lane.b32.xlu0 %v52_v10, %s265_s2 }
  0x2d   :  { %195 = vmatpush3.bf16.msra.mxu0 %v194_v11 }
  0x2e   :  { %196 = vmatprep.subr.bf16.mxu0 %v262_v0 }
  0x31   :  { %198 = vmatpush3.bf16.msra.mxu0 %v197_v14 }
  0x32   :  { %199 = vmatprep.subr.bf16.mxu0 %v262_v0 }
  0x35   :  { %201 = vmatpush3.bf16.msra.mxu0 %v200_v17 }
  0x9d   :  { %v55_v18 = vpop.permute.xlu0 %54 }
  0x9e   :  { %v58_v19 = vsel %vm57_vm1, %v43_v2, %v55_v18 }
  0x9f   :  { %188 = vmatmul.mubr.msk.f32.vlgmr.msra.gmra.mrb[0].mxu0 %vm74_vm2, %v58_v19 }
 0x172   :  { %v144_v21 = vpop.f32.mrb[0].mxu0 }
 0x173   :  { %v145_v22 = vadd.f32 %v160_v20, %v144_v21  ;;  %v189_v23 = vpop.f32.mrb[1].mxu0 }
 0x175   :  { %v148_v24 = vmul.f32 %v145_v22, %v145_v22 }
 0x177   :  { %149 = vadd.xlane.f32.xlu0 %v148_v24 }
 0x204   :  { %v150_v25 = vpop.xlane.xlu0 %149 }
 0x205   :  { %152 = vst.msk [vmem:[%s335_s4] sm:$0xff] %vm151_vm3, %v150_v25 }
 0x206   :  { %157 = vsyncpa [#allocation3], 1 }
 0x207   :  { %158 = vsyncpa [#allocation5], 1 }

</bundles_post_ra>
